<compile_context>
chip_gen: v7x
topology: tpu7x:2x2x1
jax: 0.10.0
libtpu: 0.0.40
codegen_flags: <defaults>
</compile_context>

<pallas_src>
import jax
import jax.numpy as jnp
from jax import lax
from jax.experimental import pallas as pl
from jax.experimental.pallas import tpu as pltpu


# Contract the last dim of x [tm, tk] with the last dim of w [tn, tk]
# (i.e. y = x @ w.T without materializing the transpose).
_CONTRACT_LAST = (((1,), (1,)), ((), ()))

_VMEM_LIMIT_BYTES = 32 * 1024 * 1024     # safe on v5e/v6e (128 MiB) and v7x (64 MiB)
_PATH_A_BUDGET_BYTES = 24 * 1024 * 1024  # double-buffered working-set budget


def _matmul_noreduce_kernel(x_ref, w_ref, o_ref):
    """One (tm x tn) output tile, whole hidden dim in a single MXU call."""
    o_ref[...] = lax.dot_general(
        x_ref[...],
        w_ref[...],
        dimension_numbers=_CONTRACT_LAST,
        preferred_element_type=jnp.float32,
    ).astype(o_ref.dtype)


def _matmul_reduce_kernel(x_ref, w_ref, o_ref, acc_ref):
    """One (tm x tn) output tile, reducing over the K grid axis (axis 2)."""
    k = pl.program_id(2)
    partial = lax.dot_general(
        x_ref[...],
        w_ref[...],
        dimension_numbers=_CONTRACT_LAST,
        preferred_element_type=jnp.float32,
    )

    @pl.when(k == 0)
    def _():
        acc_ref[...] = partial  # direct write: no zero-fill + add on first step

    @pl.when(k > 0)
    def _():
        acc_ref[...] += partial

    @pl.when(k == pl.num_programs(2) - 1)
    def _():
        o_ref[...] = acc_ref[...].astype(o_ref.dtype)


def _round_up(x, mult):
    return ((x + mult - 1) // mult) * mult


def _pick_row_tile(m, preferred=256):
    """Returns (tm, m_padded) with tm a multiple of 8 and m_padded % tm == 0."""
    if m <= preferred:
        tm = _round_up(m, 8)
        return tm, tm
    for cand in (preferred, 128, 64, 32, 16, 8):
        if m % cand == 0:
            return cand, m
    return preferred, _round_up(m, preferred)


def _pick_col_tile(h, candidates=(512, 256, 128)):
    """Tile for a feature axis: 256-aligned preferred (v6e/v7x 2x256 MXU),
    else 128 (fills v5e's 4x128 MXU), else the full axis (always layout-legal)."""
    for cand in candidates:
        if h % cand == 0:
            return cand
    return h


@jax.jit
def linear_attention(hidden_states, weight):
    """y = hidden_states @ weight.T  (nn.Linear, bias=False).

    hidden_states: [batch, seq, hidden]
    weight:        [hidden, hidden]   (PyTorch [out_features, in_features])
    """
    b, s, h = hidden_states.shape
    out_f, in_f = weight.shape
    assert out_f == h and in_f == h, "LinearAttention weight must be [hidden, hidden]"

    m = b * s
    x = hidden_states.reshape(m, h)
    itemsize = jnp.dtype(hidden_states.dtype).itemsize

    tm, m_pad = _pick_row_tile(m)
    tn = _pick_col_tile(h)

    if m_pad != m:
        x = jnp.pad(x, ((0, m_pad - m), (0, 0)))

    # Path A: collapse the K axis (tk == h). Double-buffered working set:
    # x stripe + weight stripe + output tile.
    path_a_bytes = 2 * (tm * h + tn * h + tm * tn) * itemsize

    if path_a_bytes <= _PATH_A_BUDGET_BYTES:
        out = pl.pallas_call(
            _matmul_noreduce_kernel,
            out_shape=jax.ShapeDtypeStruct((m_pad, h), hidden_states.dtype),
            grid_spec=pltpu.PrefetchScalarGridSpec(
                num_scalar_prefetch=0,
                grid=(m_pad // tm, h // tn),
                in_specs=[
                    pl.BlockSpec((tm, h), lambda i, j: (i, 0)),   # x rows (resident over j)
                    pl.BlockSpec((tn, h), lambda i, j: (j, 0)),   # weight stripe [out, in]
                ],
                out_specs=pl.BlockSpec((tm, tn), lambda i, j: (i, j)),
            ),
            compiler_params=pltpu.CompilerParams(
                dimension_semantics=("parallel", "parallel"),
                vmem_limit_bytes=_VMEM_LIMIT_BYTES,
            ),
        )(x, weight)
    else:
        # Large-hidden fallback: tiled K reduction with an f32 VMEM accumulator.
        # (If h is not a multiple of 128 *and* too large for Path A, tiles fall
        # back to full-h blocks and may exceed VMEM; pad hidden upstream.)
        tk = _pick_col_tile(h)
        out = pl.pallas_call(
            _matmul_reduce_kernel,
            out_shape=jax.ShapeDtypeStruct((m_pad, h), hidden_states.dtype),
            grid_spec=pltpu.PrefetchScalarGridSpec(
                num_scalar_prefetch=0,
                grid=(m_pad // tm, h // tn, h // tk),
                in_specs=[
                    pl.BlockSpec((tm, tk), lambda i, j, k: (i, k)),
                    pl.BlockSpec((tn, tk), lambda i, j, k: (j, k)),  # weight [out, in]
                ],
                out_specs=pl.BlockSpec((tm, tn), lambda i, j, k: (i, j)),
                scratch_shapes=[pltpu.VMEM((tm, tn), jnp.float32)],
            ),
            compiler_params=pltpu.CompilerParams(
                dimension_semantics=("parallel", "parallel", "arbitrary"),
                vmem_limit_bytes=_VMEM_LIMIT_BYTES,
            ),
        )(x, weight)

    if m_pad != m:
        out = out[:m]
    return out.reshape(b, s, h)


if __name__ == "__main__":
    # Small shapes consistent with the module: batch=2, seq=64, hidden=128.
    batch, seq, hidden = 2, 64, 128
    dtype = jnp.bfloat16  # stands in for config.torch_dtype

    key = jax.random.PRNGKey(0)
    k_x, k_w = jax.random.split(key)

    hidden_states = jax.random.normal(k_x, (batch, seq, hidden), dtype=jnp.float32)
    # Deterministic init of linear_attn.weight [hidden_size, hidden_size].
    weight = (
        jax.random.normal(k_w, (hidden, hidden), dtype=jnp.float32)
        * (1.0 / jnp.sqrt(hidden))
    )

    hidden_states = hidden_states.astype(dtype)
    weight = weight.astype(dtype)

    y = linear_attention(hidden_states, weight)
    y = jax.block_until_ready(y)

    # Reference check (plain JAX) to make sure semantics match nn.Linear.
    ref = jnp.einsum(
        "bsh,oh->bso",
        hidden_states.astype(jnp.float32),
        weight.astype(jnp.float32),
    ).astype(dtype)
    assert y.shape == (batch, seq, hidden)
    assert jnp.allclose(
        y.astype(jnp.float32), ref.astype(jnp.float32), atol=1e-1, rtol=1e-2
    )

    print("KERNEL_OK")
</pallas_src>

<mosaic_0001>
module attributes {stable_mosaic.version = 11 : i64} {
  func.func @_matmul_noreduce_kernel(%arg0: i32, %arg1: i32, %arg2: memref<128x128xbf16, #tpu.memory_space<vmem>>, %arg3: memref<128x128xbf16, #tpu.memory_space<vmem>>, %arg4: memref<128x128xbf16, #tpu.memory_space<vmem>>) attributes {dimension_semantics = [#tpu.dimension_semantics<parallel>, #tpu.dimension_semantics<parallel>], iteration_bounds = array<i64: 1, 1>, scalar_prefetch = 0 : i64, scratch_operands = 0 : i64, tpu.core_type = #tpu.core_type<tc>, window_params = [{transform_indices = @transform_0, window_bounds = array<i64: 128, 128>}, {transform_indices = @transform_1, window_bounds = array<i64: 128, 128>}, {transform_indices = @transform_2, window_bounds = array<i64: 128, 128>}]} {
    %c0 = arith.constant 0 : index
    %c0_0 = arith.constant 0 : index
    %0 = vector.load %arg2[%c0, %c0_0] : memref<128x128xbf16, #tpu.memory_space<vmem>>, vector<128x128xbf16>
    %c0_1 = arith.constant 0 : index
    %c0_2 = arith.constant 0 : index
    %1 = vector.load %arg3[%c0_1, %c0_2] : memref<128x128xbf16, #tpu.memory_space<vmem>>, vector<128x128xbf16>
    %cst = arith.constant dense<0.000000e+00> : vector<128x128xf32>
    %2 = tpu.matmul %0, %1, %cst {dimension_numbers = #tpu.dot_dimension_numbers<[1], [1], [0], [0], [0, 0, 1, 0], [], []>} : vector<128x128xbf16>, vector<128x128xbf16>, vector<128x128xf32> -> vector<128x128xf32>
    %3 = arith.truncf %2 : vector<128x128xf32> to vector<128x128xbf16>
    %c0_3 = arith.constant 0 : index
    %c0_4 = arith.constant 0 : index
    %4 = vector.load %arg4[%c0_3, %c0_4] : memref<128x128xbf16, #tpu.memory_space<vmem>>, vector<128x128xbf16>
    tpu.vector_store %arg4[%c0_3, %c0_4], %3 {strides = array<i32>} : memref<128x128xbf16, #tpu.memory_space<vmem>>, vector<128x128xbf16>,
    return
  }
  func.func @transform_0(%arg0: i32, %arg1: i32) -> (i32, i32) {
    %c0_i32 = arith.constant 0 : i32
    %c0_i32_0 = arith.constant 0 : i32
    return %arg0, %c0_i32 : i32, i32
  }
  func.func @transform_1(%arg0: i32, %arg1: i32) -> (i32, i32) {
    %c0_i32 = arith.constant 0 : i32
    %c0_i32_0 = arith.constant 0 : i32
    return %arg1, %c0_i32 : i32, i32
  }
  func.func @transform_2(%arg0: i32, %arg1: i32) -> (i32, i32) {
    %c0_i32 = arith.constant 0 : i32
    return %arg0, %arg1 : i32, i32
  }
}

</mosaic_0001>

<bundles_post_ra>
// kernel: linear_attention.1
= control target key start
LH: loop header
LB: loop body
LE: loop exit
PB: predicated region body
PF: predicated region fallthrough
CT: control target
= control target key end

     0   :  { %7 = vsyncpa [#allocation3], 0  ;;  %s681_s0 = inlined_call_operand.hbm [shape: bf16[128,128], index: 0, kind: input, shape index: {}]   ;;  %s682_s1 = inlined_call_operand.hbm [shape: bf16[128,128], index: 1, kind: input, shape index: {}]   ;;  %s683_s2 = inlined_call_operand.hbm [shape: bf16[128,128], index: 2, kind: output, shape index: {}]  }
   0x1   :  { %8 = vsyncpa [#allocation6], 0 }
   0x2   :  { %9 = vsyncpa [#allocation4], 0  ;;  %s616_s9 = smov [#allocation2]   ;;  %s544_s13 = scalar_lea.hbm %s681_s0, 1024 }
   0x3   :  { %s15_s10 = sshll.u32 %s616_s9, 4  ;;  %p545_p0 = scmp.ne.s32.totalorder %s681_s0, %s544_s13  ;;  %s16_s10 = int_to_ptr.vmem [resolvable:$true] %s15_s10 }
   0x4   :  { %p548_p1 = scmp.lt.u32.totalorder %s544_s13, %s681_s0 }
   0x6   :  { %p550_p2 = pnand %p548_p1, %p545_p0 }
   0x8   :  { %553 = shalt.err (!%p550_p2)
}
   0x9   :  { %s554_s18 = scalar_lea.vmem %s16_s10, 1024  ;;  %p559_p4 = scmp.lt.s32.totalorder %s16_s10, %s16_s10 }
   0xa   :  { %p555_p3 = scmp.ne.s32.totalorder %s16_s10, %s554_s18  ;;  %p560_p5 = scmp.lt.s32.totalorder %s554_s18, %s554_s18 }
   0xc   :  { %p561_p6 = por %p560_p5, %p559_p4 }
   0xe   :  { %p562_p7 = pnand %p561_p6, %p555_p3 }
  0x10   :  { %565 = shalt.err (!%p562_p7)
}
  0x11   :  { %s617_s19 = smov 64   ;;  %s618_s20 = smov 4  }
  0x12   :  { %21 = dma.hbm_to_vmem [thread:$0]  %s681_s0, 1024, %s16_s10, [#allocation3], %s617_s19, %s617_s19, %s618_s20  }
  0x13   :  { %s619_s23 = smov [#allocation5]   ;;  %s566_s27 = scalar_lea.hbm %s682_s1, 1024 }
  0x14   :  { %s27_s24 = sshll.u32 %s619_s23, 4  ;;  %p567_p8 = scmp.ne.s32.totalorder %s682_s1, %s566_s27  ;;  %s28_s24 = int_to_ptr.vmem [resolvable:$true] %s27_s24 }
  0x15   :  { %p570_p9 = scmp.lt.u32.totalorder %s566_s27, %s682_s1 }
  0x17   :  { %p572_p10 = pnand %p570_p9, %p567_p8 }
  0x19   :  { %575 = shalt.err (!%p572_p10)
}
  0x1a   :  { %s576_s4 = scalar_lea.vmem %s28_s24, 1024  ;;  %p581_p12 = scmp.lt.s32.totalorder %s28_s24, %s28_s24 }
  0x1b   :  { %p577_p11 = scmp.ne.s32.totalorder %s28_s24, %s576_s4  ;;  %p582_p13 = scmp.lt.s32.totalorder %s576_s4, %s576_s4 }
  0x1d   :  { %p583_p0 = por %p582_p13, %p581_p12 }
  0x1f   :  { %p584_p1 = pnand %p583_p0, %p577_p11 }
  0x21   :  { %587 = shalt.err (!%p584_p1)
}
  0x22   :  { %33 = dma.hbm_to_vmem [thread:$0]  %s682_s1, 1024, %s28_s24, [#allocation6], %s617_s19, %s617_s19, %s618_s20  }
  0x23   :  { %610 = dma.done.wait [#allocation3], 1024  }
  0x24   :  { %611 = vsyncadd [#allocation3], 4294966272 }
  0x25   :  { %612 = dma.done.wait [#allocation6], 1024  }
  0x26   :  { %613 = vsyncadd [#allocation6], 4294966272  ;;  %v528_v0 = vld [vmem:[#allocation5] sm:$0xff]   ;;  %v529_v1 = vld [vmem:[#allocation5 + $0x8] sm:$0xff]   ;;  %s620_s1 = smov [#allocation7]  }
  0x27   :  { %475 = vmatprep.subr.bf16.mxu0 %v528_v0  ;;  %507 = vmatprep.subr.bf16.mxu1 %v528_v0  ;;  %v530_v2 = vld [vmem:[#allocation5 + $0x10] sm:$0xff]   ;;  %v536_v3 = vld [vmem:[#allocation2] sm:$0xff]   ;;  %v531_v5 = vld [vmem:[#allocation5 + $0x18] sm:$0xff]   ;;  %s351_s6 = sshll.u32 %s620_s1, 4  ;;  %s352_s6 = int_to_ptr.vmem [resolvable:$true] %s351_s6 }
  0x28   :  { %476 = vmatpush3.bf16.xpose.msra.mxu0 %v528_v0  ;;  %515 = vmatpush3.bf16.xpose.msra.mxu1 %v528_v0  ;;  %v537_v4 = vld [vmem:[#allocation2 + $0x20] sm:$0xff]   ;;  %v533_v7 = vld [vmem:[#allocation5 + $0x28] sm:$0xff]   ;;  %v534_v8 = vld [vmem:[#allocation5 + $0x30] sm:$0xff]   ;;  %s588_s7 = scalar_lea.vmem %s352_s6, 1024  ;;  %p593_p3 = scmp.lt.s32.totalorder %s352_s6, %s352_s6 }
  0x29   :  { %477 = vmatprep.subr.bf16.mxu0 %v529_v1  ;;  %508 = vmatprep.subr.bf16.mxu1 %v529_v1  ;;  %v532_v6 = vld [vmem:[#allocation5 + $0x20] sm:$0xff]   ;;  %v535_v9 = vld [vmem:[#allocation5 + $0x38] sm:$0xff]   ;;  %v538_v10 = vld [vmem:[#allocation2 + $0x8] sm:$0xff]   ;;  %p589_p2 = scmp.ne.s32.totalorder %s352_s6, %s588_s7  ;;  %p594_p4 = scmp.lt.s32.totalorder %s588_s7, %s588_s7 }
  0x2a   :  { %491 = vmatprep.mubr.bf16.mxu0 %v536_v3  ;;  %499 = vmatprep.mubr.bf16.mxu1 %v537_v4  ;;  %v539_v11 = vld [vmem:[#allocation2 + $0x28] sm:$0xff]   ;;  %v540_v12 = vld [vmem:[#allocation2 + $0x10] sm:$0xff]   ;;  %v542_v14 = vld [vmem:[#allocation2 + $0x18] sm:$0xff]  }
  0x2b   :  { %v541_v13 = vld [vmem:[#allocation2 + $0x30] sm:$0xff]   ;;  %v543_v15 = vld [vmem:[#allocation2 + $0x38] sm:$0xff]   ;;  %p595_p5 = por %p594_p4, %p593_p3 }
  0x2d   :  { %p596_p6 = pnand %p595_p5, %p589_p2 }
  0x30   :  { %478 = vmatpush3.bf16.xpose.msra.mxu0 %v529_v1  ;;  %516 = vmatpush3.bf16.xpose.msra.mxu1 %v529_v1 }
  0x31   :  { %479 = vmatprep.subr.bf16.mxu0 %v530_v2  ;;  %509 = vmatprep.subr.bf16.mxu1 %v530_v2 }
  0x38   :  { %480 = vmatpush3.bf16.xpose.msra.mxu0 %v530_v2  ;;  %517 = vmatpush3.bf16.xpose.msra.mxu1 %v530_v2 }
  0x39   :  { %481 = vmatprep.subr.bf16.mxu0 %v531_v5  ;;  %510 = vmatprep.subr.bf16.mxu1 %v531_v5 }
  0x40   :  { %482 = vmatpush3.bf16.xpose.msra.mxu0 %v531_v5  ;;  %518 = vmatpush3.bf16.xpose.msra.mxu1 %v531_v5 }
  0x41   :  { %483 = vmatprep.subr.bf16.mxu0 %v532_v6  ;;  %511 = vmatprep.subr.bf16.mxu1 %v532_v6 }
  0x48   :  { %484 = vmatpush3.bf16.xpose.msra.mxu0 %v532_v6  ;;  %519 = vmatpush3.bf16.xpose.msra.mxu1 %v532_v6 }
  0x49   :  { %485 = vmatprep.subr.bf16.mxu0 %v533_v7  ;;  %512 = vmatprep.subr.bf16.mxu1 %v533_v7 }
  0x50   :  { %486 = vmatpush3.bf16.xpose.msra.mxu0 %v533_v7  ;;  %520 = vmatpush3.bf16.xpose.msra.mxu1 %v533_v7 }
  0x51   :  { %487 = vmatprep.subr.bf16.mxu0 %v534_v8  ;;  %513 = vmatprep.subr.bf16.mxu1 %v534_v8 }
  0x58   :  { %488 = vmatpush3.bf16.xpose.msra.mxu0 %v534_v8  ;;  %521 = vmatpush3.bf16.xpose.msra.mxu1 %v534_v8 }
  0x59   :  { %489 = vmatprep.subr.bf16.mxu0 %v535_v9  ;;  %514 = vmatprep.subr.bf16.mxu1 %v535_v9 }
  0x60   :  { %490 = vmatpush3.bf16.xpose.msra.mxu0 %v535_v9  ;;  %522 = vmatpush3.bf16.xpose.msra.mxu1 %v535_v9 }
  0x67   :  { %492 = vmatmul.mubr.bf16.vlgmr.msra.gmra.mrb[0].mxu0 %v538_v10  ;;  %500 = vmatmul.mubr.bf16.vlgmr.msra.gmra.mrb[0].mxu1 %v539_v11 }
  0x68   :  { %495 = vmatprep.mubr.bf16.mxu0 %v540_v12  ;;  %503 = vmatprep.mubr.bf16.mxu1 %v541_v13 }
  0x6f   :  { %496 = vmatmul.mubr.bf16.gmra.mrb[4].mxu0 %v542_v14  ;;  %504 = vmatmul.mubr.bf16.gmra.mrb[4].mxu1 %v543_v15 }
 0x13a   :  { %v493_v16 = vpop.f32.mrb[0].mxu0  ;;  %v501_v17 = vpop.f32.mrb[0].mxu1 }
 0x13b   :  { %v203_v18 = vpop.f32.mrb[1].mxu0  ;;  %v235_v19 = vpop.f32.mrb[1].mxu1 }
 0x13c   :  { %v494_v20 = vpop.f32.mrb[2].mxu0  ;;  %v502_v21 = vpop.f32.mrb[2].mxu1 }
 0x13d   :  { %v420_v22 = vpack.c.bf16 %v494_v20, %v493_v16  ;;  %v440_v23 = vpack.c.bf16 %v502_v21, %v501_v17  ;;  %v206_v24 = vpop.f32.mrb[3].mxu0  ;;  %v238_v25 = vpop.f32.mrb[3].mxu1 }
 0x13e   :  { %v415_v26 = vpack.c.bf16 %v206_v24, %v203_v18  ;;  %v435_v27 = vpack.c.bf16 %v238_v25, %v235_v19 }
 0x13f   :  { %452 = vst [vmem:[#allocation7 + $0x8] sm:$0xff] %v420_v22   ;;  %456 = vst [vmem:[#allocation7 + $0x28] sm:$0xff] %v440_v23  }
 0x140   :  { %416 = vst [vmem:[#allocation7] sm:$0xff] %v415_v26   ;;  %455 = vst [vmem:[#allocation7 + $0x20] sm:$0xff] %v435_v27  }
 0x142   :  { %v497_v28 = vpop.f32.mrb[4].mxu0  ;;  %v505_v29 = vpop.f32.mrb[4].mxu1 }
 0x143   :  { %v219_v30 = vpop.f32.mrb[5].mxu0  ;;  %v251_v31 = vpop.f32.mrb[5].mxu1 }
 0x144   :  { %v498_v32 = vpop.f32.mrb[6].mxu0  ;;  %v506_v33 = vpop.f32.mrb[6].mxu1 }
 0x145   :  { %v430_v34 = vpack.c.bf16 %v498_v32, %v497_v28  ;;  %v450_v35 = vpack.c.bf16 %v506_v33, %v505_v29  ;;  %v222_v36 = vpop.f32.mrb[7].mxu0  ;;  %v254_v37 = vpop.f32.mrb[7].mxu1 }
 0x146   :  { %v425_v38 = vpack.c.bf16 %v222_v36, %v219_v30  ;;  %v445_v39 = vpack.c.bf16 %v254_v37, %v251_v31 }
 0x147   :  { %454 = vst [vmem:[#allocation7 + $0x18] sm:$0xff] %v430_v34   ;;  %458 = vst [vmem:[#allocation7 + $0x38] sm:$0xff] %v450_v35  }
 0x148   :  { %453 = vst [vmem:[#allocation7 + $0x10] sm:$0xff] %v425_v38   ;;  %457 = vst [vmem:[#allocation7 + $0x30] sm:$0xff] %v445_v39  }
 0x149   :  { %599 = shalt.err (!%p596_p6)
}
 0x14a   :  { %s600_s10 = scalar_lea.hbm %s683_s2, 1024 }
 0x14b   :  { %p601_p7 = scmp.ne.s32.totalorder %s683_s2, %s600_s10  ;;  %p604_p8 = scmp.lt.u32.totalorder %s600_s10, %s683_s2 }
 0x14d   :  { %p606_p9 = pnand %p604_p8, %p601_p7 }
 0x14f   :  { %609 = shalt.err (!%p606_p9)
}
 0x150   :  { %357 = dma.vmem_to_hbm [thread:$0]  %s352_s6, 1024, %s683_s2, [#allocation4], %s617_s19, %s617_s19, %s618_s20  }
 0x151   :  { %614 = dma.done.wait [#allocation4], 1024  }
 0x152   :  { %615 = vsyncadd [#allocation4], 4294966272 }
 0x153   :  { %361 = vsyncpa [#allocation3], 1 }
 0x154   :  { %362 = vsyncpa [#allocation6], 1 }
 0x155   :  { %363 = vsyncpa [#allocation4], 1 }

</bundles_post_ra>
